<compile_context>
chip_gen: v7x
topology: tpu7x:2x2x1
jax: 0.10.0
libtpu: 0.0.40
codegen_flags: <defaults>
</compile_context>

<pallas_src>
from functools import partial

import jax
import jax.numpy as jnp
from jax.experimental import pallas as pl
from jax.experimental.pallas import tpu as pltpu


def _repact_kernel(w_ref, x_ref, o_ref):
    # w_ref: SMEM (4,) float32 = [a, b, c, d] with
    #   a = w_identity
    #   b = w_relu + w_prelu            (coefficient of x when x >= 0)
    #   c = prelu_alpha * w_prelu       (coefficient of x when x <  0)
    #   d = w_hardswish / 6             (coefficient of x * relu6(x + 3))
    x = x_ref[...].astype(jnp.float32)
    a = w_ref[0]
    b = w_ref[1]
    c = w_ref[2]
    d = w_ref[3]
    coef = a + jnp.where(x >= 0.0, b, c) + d * jnp.clip(x + 3.0, 0.0, 6.0)
    o_ref[...] = (x * coef).astype(o_ref.dtype)


def _fold_weights(actor_atn, prelu_alpha):
    """Fold the 4 activation weights + PReLU alpha into 4 scalars."""
    w = actor_atn.astype(jnp.float32).reshape(4)
    alpha = jnp.asarray(prelu_alpha, jnp.float32).reshape(())
    return jnp.stack([w[0], w[1] + w[3], alpha * w[3], w[2] / 6.0])


def _apply_folded_jnp(x, params, out_dtype):
    """Tiny pure-jnp epilogue for the ragged tail (< lanes elements)."""
    xf = x.astype(jnp.float32)
    coef = (params[0]
            + jnp.where(xf >= 0.0, params[1], params[2])
            + params[3] * jnp.clip(xf + 3.0, 0.0, 6.0))
    return (xf * coef).astype(out_dtype)


def _round_up(v, m):
    return ((v + m - 1) // m) * m


@partial(jax.jit, static_argnames=("lanes", "block_bytes"))
def repact_origin(x, actor_atn, prelu_alpha, *, lanes=1024,
                  block_bytes=4 * 1024 * 1024):
    """x: array of any shape/dtype (e.g. NCHW). actor_atn: (4,), prelu_alpha: scalar."""
    orig_shape = x.shape
    orig_dtype = x.dtype
    itemsize = jnp.dtype(orig_dtype).itemsize

    params = _fold_weights(actor_atn, prelu_alpha)

    flat = x.reshape(-1)                       # row-major flatten (view-like under jit)
    n = flat.shape[0]
    rows = n // lanes                          # lane-divisible prefix
    n_main = rows * lanes
    n_tail = n - n_main

    # ---- main lane-dense slab through the Pallas kernel -------------------
    if rows > 0:
        x2d = flat[:n_main].reshape(rows, lanes)

        # Block row count: ~block_bytes-sized tiles for big tensors, but keep
        # >= 4 grid steps for medium ones so DMA/compute pipelining (and both
        # v7x TensorCores) stay active. Row tiles are multiples of 8 so stores
        # stay unmasked; only the final ragged grid block ever masks.
        max_tr = max(8, (block_bytes // (lanes * itemsize)) // 8 * 8)
        if rows <= 32:
            tr = rows                               # tiny: one block is fine
        else:
            tr = min(max_tr, _round_up(pl.cdiv(rows, 4), 8))
        grid = (pl.cdiv(rows, tr),)

        main_out = pl.pallas_call(
            _repact_kernel,
            out_shape=jax.ShapeDtypeStruct((rows, lanes), orig_dtype),
            grid_spec=pltpu.PrefetchScalarGridSpec(
                num_scalar_prefetch=0,
                grid=grid,
                in_specs=[
                    pl.BlockSpec(memory_space=pltpu.SMEM),           # folded weights
                    pl.BlockSpec((tr, lanes), lambda i: (i, 0)),     # x tile
                ],
                out_specs=pl.BlockSpec((tr, lanes), lambda i: (i, 0)),
            ),
            compiler_params=pltpu.CompilerParams(
                dimension_semantics=("parallel",),
                vmem_limit_bytes=40 * 1024 * 1024,
            ),
            cost_estimate=pl.CostEstimate(
                flops=9 * n_main,
                transcendentals=0,
                bytes_accessed=2 * n_main * itemsize,
            ),
            # TODO(synk): expose input_output_aliases={1: 0} when the caller can
            # donate x (activation overwriting its input) to drop the output alloc.
        )(params, x2d)
        main_flat = main_out.reshape(-1)
    else:
        main_flat = None

    # ---- ragged tail (< lanes elements) via tiny jnp epilogue -------------
    if n_tail > 0:
        tail_out = _apply_folded_jnp(flat[n_main:], params, orig_dtype)
        if main_flat is None:
            out_flat = tail_out
        else:
            out_flat = jnp.concatenate([main_flat, tail_out])
    else:
        out_flat = main_flat

    return out_flat.reshape(orig_shape)


def repact_origin_ref(x, actor_atn, prelu_alpha):
    """Pure-JAX reference mirroring the PyTorch forward."""
    xf = x.astype(jnp.float32)
    x_identity = xf * actor_atn[0]
    x_relu = jnp.maximum(xf, 0.0) * actor_atn[1]
    x_hswish = (xf * jnp.clip(xf + 3.0, 0.0, 6.0) / 6.0) * actor_atn[2]
    x_prelu = jnp.where(xf >= 0.0, xf, prelu_alpha * xf) * actor_atn[3]
    return (x_relu + x_identity + x_hswish + x_prelu).astype(x.dtype)


if __name__ == "__main__":
    key = jax.random.PRNGKey(0)

    # Deterministic parameter init (mirrors __init__):
    #   ActorAtn = nn.Parameter(torch.tensor(initWeight)) -> initWeight = [1., 1., 1., 1.]
    #   nn.PReLU() default single alpha = 0.25
    actor_atn = jnp.array([1.0, 1.0, 1.0, 1.0], dtype=jnp.float32)
    prelu_alpha = jnp.float32(0.25)

    def check(xx):
        out = jax.block_until_ready(repact_origin(xx, actor_atn, prelu_alpha))
        ref = repact_origin_ref(xx, actor_atn, prelu_alpha)
        assert out.shape == xx.shape and out.dtype == xx.dtype
        assert jnp.allclose(out, ref, atol=1e-5, rtol=1e-5)

    # Small NCHW input consistent with a conv-style feature map (divisible path).
    x = jax.random.normal(key, (2, 4, 16, 16), dtype=jnp.float32) * 4.0
    check(x)

    # Ragged shape (not a multiple of the lane width) -> kernel prefix + jnp tail.
    x2 = jax.random.normal(jax.random.PRNGKey(0), (3, 5, 7, 11), dtype=jnp.float32) * 4.0
    check(x2)

    # Medium tensor -> multi-step grid (exercises DMA/compute pipelining path).
    x3 = jax.random.normal(jax.random.PRNGKey(0), (8, 32, 64, 64), dtype=jnp.float32) * 4.0
    check(x3)

    # Tiny tensor smaller than one lane row -> pure jnp path.
    x4 = jax.random.normal(jax.random.PRNGKey(0), (7,), dtype=jnp.float32) * 4.0
    check(x4)

    print("KERNEL_OK")
</pallas_src>

<mosaic_0001>
module attributes {stable_mosaic.version = 11 : i64} {
  func.func @_repact_kernel(%arg0: i32, %arg1: memref<4xf32, #tpu.memory_space<smem>>, %arg2: memref<2x1024xf32, #tpu.memory_space<vmem>>, %arg3: memref<2x1024xf32, #tpu.memory_space<vmem>>) attributes {dimension_semantics = [#tpu.dimension_semantics<parallel>], iteration_bounds = array<i64: 1>, scalar_prefetch = 0 : i64, scratch_operands = 0 : i64, tpu.core_type = #tpu.core_type<tc>, window_params = [{transform_indices = @transform_0, window_bounds = array<i64: 4>}, {transform_indices = @transform_1, window_bounds = array<i64: 2, 1024>}, {transform_indices = @transform_2, window_bounds = array<i64: 2, 1024>}]} {
    %c0 = arith.constant 0 : index
    %c0_0 = arith.constant 0 : index
    %0 = vector.load %arg2[%c0, %c0_0] : memref<2x1024xf32, #tpu.memory_space<vmem>>, vector<2x1024xf32>
    %c0_1 = arith.constant 0 : index
    %1 = memref.load %arg1[%c0_1] : memref<4xf32, #tpu.memory_space<smem>>
    %c1 = arith.constant 1 : index
    %2 = memref.load %arg1[%c1] : memref<4xf32, #tpu.memory_space<smem>>
    %c2 = arith.constant 2 : index
    %3 = memref.load %arg1[%c2] : memref<4xf32, #tpu.memory_space<smem>>
    %c3 = arith.constant 3 : index
    %4 = memref.load %arg1[%c3] : memref<4xf32, #tpu.memory_space<smem>>
    %cst = arith.constant 0.000000e+00 : f32
    %5 = vector.broadcast %cst : f32 to vector<2x1024xf32>
    %6 = arith.cmpf oge, %0, %5 : vector<2x1024xf32>
    %7 = vector.broadcast %2 : f32 to vector<2x1024xf32>
    %8 = vector.broadcast %3 : f32 to vector<2x1024xf32>
    %9 = arith.select %6, %7, %8 : vector<2x1024xi1>, vector<2x1024xf32>
    %10 = vector.broadcast %1 : f32 to vector<2x1024xf32>
    %11 = arith.addf %10, %9 : vector<2x1024xf32>
    %cst_2 = arith.constant 3.000000e+00 : f32
    %12 = vector.broadcast %cst_2 : f32 to vector<2x1024xf32>
    %13 = arith.addf %0, %12 : vector<2x1024xf32>
    %cst_3 = arith.constant 0.000000e+00 : f32
    %cst_4 = arith.constant 6.000000e+00 : f32
    %14 = vector.broadcast %cst_3 : f32 to vector<2x1024xf32>
    %15 = arith.maximumf %14, %13 : vector<2x1024xf32>
    %16 = vector.broadcast %cst_4 : f32 to vector<2x1024xf32>
    %17 = arith.minimumf %16, %15 : vector<2x1024xf32>
    %18 = vector.broadcast %4 : f32 to vector<2x1024xf32>
    %19 = arith.mulf %18, %17 : vector<2x1024xf32>
    %20 = arith.addf %11, %19 : vector<2x1024xf32>
    %21 = arith.mulf %0, %20 : vector<2x1024xf32>
    %c0_5 = arith.constant 0 : index
    %c0_6 = arith.constant 0 : index
    %22 = vector.load %arg3[%c0_5, %c0_6] : memref<2x1024xf32, #tpu.memory_space<vmem>>, vector<2x1024xf32>
    tpu.vector_store %arg3[%c0_5, %c0_6], %21 {strides = array<i32>} : memref<2x1024xf32, #tpu.memory_space<vmem>>, vector<2x1024xf32>,
    return
  }
  func.func @transform_0(%arg0: i32) -> i32 {
    %c0_i32 = arith.constant 0 : i32
    %c0_i32_0 = arith.constant 0 : i32
    return %c0_i32 : i32
  }
  func.func @transform_1(%arg0: i32) -> (i32, i32) {
    %c0_i32 = arith.constant 0 : i32
    %c0_i32_0 = arith.constant 0 : i32
    return %arg0, %c0_i32 : i32, i32
  }
  func.func @transform_2(%arg0: i32) -> (i32, i32) {
    %c0_i32 = arith.constant 0 : i32
    %c0_i32_0 = arith.constant 0 : i32
    return %arg0, %c0_i32 : i32, i32
  }
}

</mosaic_0001>

<bundles_post_ra>
// kernel: repact_origin.1
= control target key start
LH: loop header
LB: loop body
LE: loop exit
PB: predicated region body
PF: predicated region fallthrough
CT: control target
= control target key end

     0   :  { %7 = vsyncpa [#allocation3], 0  ;;  %s108_s0 = inlined_call_operand.vmem [shape: f32[4], index: 0, kind: input, shape index: {}]   ;;  %s109_s1 = inlined_call_operand.vmem [shape: f32[2,1024], index: 1, kind: input, shape index: {}]   ;;  %s110_s2 = inlined_call_operand.vmem [shape: f32[2,1024], index: 2, kind: output, shape index: {}]  }
   0x1   :  { %s14_s11 = sshll.u32 %s108_s0, 4  ;;  %s15_s11 = int_to_ptr.vmem [resolvable:$true] %s14_s11 }
   0x2   :  { %s63_s12 = scalar_lea.vmem %s15_s11, 16  ;;  %p68_p1 = scmp.lt.s32.totalorder %s15_s11, %s15_s11 }
   0x3   :  { %p64_p0 = scmp.ne.s32.totalorder %s15_s11, %s63_s12  ;;  %p69_p2 = scmp.lt.s32.totalorder %s63_s12, %s63_s12 }
   0x5   :  { %p70_p3 = por %p69_p2, %p68_p1 }
   0x7   :  { %p71_p4 = pnand %p70_p3, %p64_p0 }
   0x9   :  { %74 = shalt.err (!%p71_p4)
}
   0xa   :  { %s77_s13 = smov [#allocation2]  }
   0xb   :  { %17 = dma.vmem_to_smem %s15_s11, 16, %s77_s13, [#allocation3]  }
   0xc   :  { %75 = dma.done.wait [#allocation3], 16  }
   0xd   :  { %76 = vsyncadd [#allocation3], 4294967280 }
   0xe   :  { %23 = sfence }
   0xf   :  { %v24_v0 = vld [vmem:[%s109_s1] sm:$0xff]  ;;  %s26_s16 = sld [smem:[#allocation2]]  ;;  %s59_s17 = sld [smem:[#allocation2 + $0x1]]  ;;  %v25_v1 = vld [vmem:[%s109_s1 + $0x8] sm:$0xff] }
  0x10   :  { %s60_s19 = sld [smem:[#allocation2 + $0x2]]  ;;  %s61_s20 = sld [smem:[#allocation2 + $0x3]]  ;;  %v39_v2 = vadd.f32 3.0, %v24_v0  ;;  %v40_v3 = vadd.f32 3.0, %v25_v1  ;;  %vm30_vm0 = vcmp.ge.f32.partialorder %v24_v0, 0.0  ;;  %vm31_vm1 = vcmp.ge.f32.partialorder %v25_v1, 0.0 }
  0x12   :  { %v41_v4 = vmax.f32 %v39_v2, 0.0  ;;  %v42_v5 = vmax.f32 %v40_v3, 0.0 }
  0x14   :  { %v43_v6 = vmin.f32 %v41_v4, 6.0  ;;  %v44_v9 = vmin.f32 %v42_v5, 6.0 }
  0x15   :  { %v32_v7 = vstv %s59_s17  ;;  %v36_v8 = vstv %s26_s16 }
  0x16   :  { %v33_v10 = vstv %s60_s19  ;;  %v45_v11 = vstv %s61_s20 }
  0x17   :  { %v34_v12 = vsel %vm30_vm0, %v32_v7, %v33_v10  ;;  %v46_v13 = vmul.f32 %v45_v11, %v43_v6  ;;  %v35_v14 = vsel %vm31_vm1, %v32_v7, %v33_v10  ;;  %v47_v15 = vmul.f32 %v45_v11, %v44_v9 }
  0x18   :  { %v37_v16 = vadd.f32 %v36_v8, %v34_v12  ;;  %v38_v17 = vadd.f32 %v36_v8, %v35_v14 }
  0x1a   :  { %v48_v18 = vadd.f32 %v46_v13, %v37_v16  ;;  %v49_v19 = vadd.f32 %v47_v15, %v38_v17 }
  0x1c   :  { %v50_v20 = vmul.f32 %v48_v18, %v24_v0  ;;  %v51_v21 = vmul.f32 %v49_v19, %v25_v1 }
  0x1e   :  { %52 = vst [vmem:[%s110_s2] sm:$0xff] %v50_v20  ;;  %53 = vst [vmem:[%s110_s2 + $0x8] sm:$0xff] %v51_v21 }
  0x1f   :  { %58 = vsyncpa [#allocation3], 1 }

</bundles_post_ra>
